<compile_context>
chip_gen: v5e
topology: v5e:2x2
jax: 0.10.0
libtpu: 0.0.40
codegen_flags: <defaults>
</compile_context>

<pallas_src>
import functools

import jax
import jax.numpy as jnp
from jax.experimental import pallas as pl
from jax.experimental.pallas import tpu as pltpu


def _local_attention_kernel(xp_ref, w12_ref, v_ref, o_ref, *, T, H, K, pad0, Bb):
    """One batch-block (Bb batch elements) per grid step.

    xp_ref  : (Bb, T+K-1, H)   time-padded inputs
    w12_ref : (H, 2H)          [w1 | w2] fused weight
    v_ref   : (1, H)           v transposed to a lane-dense row
    o_ref   : (Bb, T, H)       output
    """
    w12 = w12_ref[...]                                   # (H, 2H)
    v_row = v_ref[...]                                   # (1, H)

    for b in range(Bb):                                  # Bb is small & static
        xp = xp_ref[b]                                   # (Tp, H)

        # Single fused MXU product: [xp@w1 | xp@w2]
        c = jnp.dot(xp, w12, preferred_element_type=jnp.float32)   # (Tp, 2H)
        a = c[pad0:pad0 + T, :H]                         # inputs @ w1   (T, H)
        bw = c[:, H:]                                    # xp @ w2       (Tp, H)

        # Per-offset score s_k = sum_h tanh(bw[k:k+T] + a) * v_h   (VPU + XLU)
        scores = []
        for k in range(K):                               # K small & static
            t = jnp.tanh(bw[k:k + T, :] + a)             # (T, H)
            scores.append(jnp.sum(t * v_row, axis=-1, keepdims=True))   # (T, 1)

        # softmax over the K window offsets (K scalar columns; hidden stays
        # lane-dense instead of materializing a (T, K) tile)
        m = scores[0]
        for s in scores[1:]:
            m = jnp.maximum(m, s)
        exps = [jnp.exp(s - m) for s in scores]
        denom = exps[0]
        for e in exps[1:]:
            denom = denom + e
        inv_denom = pl.reciprocal(denom, approx=True)    # EUP slot

        # output = sum_k weight_k * local_k ; local_k re-sliced from the VMEM
        # ref (cheap vld) instead of holding K full tiles live.
        out = jnp.zeros((T, H), jnp.float32)
        for k in range(K):
            lk = xp_ref[b, k:k + T, :]                   # (T, H)
            out = out + (exps[k] * inv_denom) * lk.astype(jnp.float32)

        o_ref[b] = out.astype(o_ref.dtype)


def _pick_batch_block(B, bytes_per_batch, target_bytes=2 << 20):
    """Largest divisor of B whose activation block stays under ~2 MiB."""
    best = 1
    for d in range(1, B + 1):
        if B % d == 0 and d * bytes_per_batch <= target_bytes:
            best = d
    return best


def local_attention(inputs, w1, w2, v, *, kernel_size=3, batch_block=None):
    """Pallas implementation of LocalAttention.forward(inputs, mask=None)."""
    B, T, H = inputs.shape
    K = kernel_size

    # same padding rule as the module: pad = (p, p) or (p, p+1)
    p = (K - 1) // 2
    pad = (p, p + 1) if (K - 1) % 2 else (p, p)
    pad0 = pad[0]
    x_padded = jnp.pad(inputs, ((0, 0), (pad[0], pad[1]), (0, 0)))  # (B, Tp, H)
    Tp = T + K - 1

    # Fuse the two projection weights (one MXU push sequence, one DMA stream).
    w12 = jnp.concatenate([w1, w2], axis=1)              # (H, 2H)
    v_row = jnp.reshape(v, (1, H))                       # lane-dense v

    itemsize = jnp.dtype(inputs.dtype).itemsize
    if batch_block is None:
        batch_block = _pick_batch_block(B, (Tp + T) * H * itemsize)
    assert B % batch_block == 0, "batch_block must divide batch size"
    Bb = batch_block

    kernel = functools.partial(
        _local_attention_kernel, T=T, H=H, K=K, pad0=pad0, Bb=Bb
    )

    return pl.pallas_call(
        kernel,
        out_shape=jax.ShapeDtypeStruct((B, T, H), inputs.dtype),
        grid_spec=pltpu.PrefetchScalarGridSpec(
            num_scalar_prefetch=0,
            grid=(B // Bb,),
            in_specs=[
                pl.BlockSpec((Bb, Tp, H), lambda g: (g, 0, 0)),
                pl.BlockSpec((H, 2 * H), lambda g: (0, 0)),
                pl.BlockSpec((1, H), lambda g: (0, 0)),
            ],
            out_specs=pl.BlockSpec((Bb, T, H), lambda g: (g, 0, 0)),
        ),
        compiler_params=pltpu.CompilerParams(
            dimension_semantics=("parallel",),
            vmem_limit_bytes=64 * 1024 * 1024,
        ),
    )(x_padded, w12, v_row)


def _orthogonal(key, shape, dtype=jnp.float32):
    """Deterministic stand-in for nn.init.orthogonal_ (QR of a normal draw)."""
    rows, cols = shape
    a = jax.random.normal(key, (rows, max(rows, cols)), dtype)
    q, _ = jnp.linalg.qr(a.T if rows < cols else a)
    q = q.T if rows < cols else q
    return q[:rows, :cols].astype(dtype)


def _reference(inputs, w1, w2, v, kernel_size=3):
    """Pure-JAX replica of the PyTorch forward for correctness checking."""
    B, T, H = inputs.shape
    K = kernel_size
    p = (K - 1) // 2
    pad = (p, p + 1) if (K - 1) % 2 else (p, p)
    x = jnp.pad(inputs, ((0, 0), (pad[0], pad[1]), (0, 0)))
    local = jnp.stack([x[:, i:i + K, :] for i in range(T)], axis=1)  # (B,T,K,H)
    score = jnp.squeeze(
        jnp.tanh(local @ w2 + (inputs @ w1)[:, :, None, :]) @ v, axis=-1
    )                                                                # (B,T,K)
    weight = jax.nn.softmax(score, axis=-1)[..., None]               # (B,T,K,1)
    out = jnp.squeeze(jnp.swapaxes(local, -1, -2) @ weight, axis=-1) # (B,T,H)
    return out


if __name__ == "__main__":
    B, T, H, K = 2, 8, 32, 3

    key = jax.random.PRNGKey(0)
    k_x, k_v, k_w1, k_w2 = jax.random.split(key, 4)

    inputs = jax.random.normal(k_x, (B, T, H), jnp.float32)
    v = _orthogonal(k_v, (H, 1))
    w1 = _orthogonal(k_w1, (H, H))
    w2 = _orthogonal(k_w2, (H, H))

    out = local_attention(inputs, w1, w2, v, kernel_size=K)
    out = jax.block_until_ready(out)

    ref = _reference(inputs, w1, w2, v, kernel_size=K)
    assert out.shape == (B, T, H)
    # tolerance accounts for the approx (EUP) reciprocal in the softmax denom
    assert jnp.allclose(out, ref, atol=2e-3, rtol=2e-3), "mismatch vs reference"

    print("KERNEL_OK")
</pallas_src>

<mosaic_0001>
module attributes {stable_mosaic.version = 11 : i64} {
  func.func @_local_attention_kernel(%arg0: i32, %arg1: memref<2x10x32xf32, #tpu.memory_space<vmem>>, %arg2: memref<32x64xf32, #tpu.memory_space<vmem>>, %arg3: memref<1x32xf32, #tpu.memory_space<vmem>>, %arg4: memref<2x8x32xf32, #tpu.memory_space<vmem>>) attributes {dimension_semantics = [#tpu.dimension_semantics<parallel>], iteration_bounds = array<i64: 1>, scalar_prefetch = 0 : i64, scratch_operands = 0 : i64, tpu.core_type = #tpu.core_type<tc>, window_params = [{transform_indices = @transform_0, window_bounds = array<i64: 2, 10, 32>}, {pipeline_mode = #tpu.pipeline_mode<synchronous>, transform_indices = @transform_1, window_bounds = array<i64: 32, 64>}, {pipeline_mode = #tpu.pipeline_mode<synchronous>, transform_indices = @transform_2, window_bounds = array<i64: 1, 32>}, {transform_indices = @transform_3, window_bounds = array<i64: 2, 8, 32>}]} {
    %c0 = arith.constant 0 : index
    %c0_0 = arith.constant 0 : index
    %0 = vector.load %arg2[%c0, %c0_0] : memref<32x64xf32, #tpu.memory_space<vmem>>, vector<32x64xf32>
    %c0_1 = arith.constant 0 : index
    %c0_2 = arith.constant 0 : index
    %1 = vector.load %arg3[%c0_1, %c0_2] : memref<1x32xf32, #tpu.memory_space<vmem>>, vector<1x32xf32>
    %c0_3 = arith.constant 0 : index
    %c0_4 = arith.constant 0 : index
    %c0_5 = arith.constant 0 : index
    %2 = vector.load %arg1[%c0_3, %c0_4, %c0_5] : memref<2x10x32xf32, #tpu.memory_space<vmem>>, vector<1x10x32xf32>
    %3 = vector.shape_cast %2 : vector<1x10x32xf32> to vector<10x32xf32>
    %cst = arith.constant dense<0.000000e+00> : vector<10x64xf32>
    %4 = tpu.matmul %3, %0, %cst {dimension_numbers = #tpu.dot_dimension_numbers<[1], [0], [0], [1], [0, 0, 1, 1], [], []>} : vector<10x32xf32>, vector<32x64xf32>, vector<10x64xf32> -> vector<10x64xf32>
    %5 = vector.extract_strided_slice %4 {offsets = [1, 0], sizes = [8, 32], strides = [1, 1]} : vector<10x64xf32> to vector<8x32xf32>
    %6 = vector.extract_strided_slice %4 {offsets = [0, 32], sizes = [10, 32], strides = [1, 1]} : vector<10x64xf32> to vector<10x32xf32>
    %7 = vector.extract_strided_slice %6 {offsets = [0, 0], sizes = [8, 32], strides = [1, 1]} : vector<10x32xf32> to vector<8x32xf32>
    %8 = arith.addf %7, %5 : vector<8x32xf32>
    %9 = math.tanh %8 : vector<8x32xf32>
    %10 = vector.broadcast %1 : vector<1x32xf32> to vector<8x32xf32>
    %11 = arith.mulf %9, %10 : vector<8x32xf32>
    %cst_6 = arith.constant dense<0.000000e+00> : vector<8xf32>
    %12 = vector.multi_reduction <add>, %11, %cst_6 [1] : vector<8x32xf32> to vector<8xf32>
    %13 = vector.shape_cast %12 : vector<8xf32> to vector<8x1xf32>
    %14 = vector.extract_strided_slice %6 {offsets = [1, 0], sizes = [8, 32], strides = [1, 1]} : vector<10x32xf32> to vector<8x32xf32>
    %15 = arith.addf %14, %5 : vector<8x32xf32>
    %16 = math.tanh %15 : vector<8x32xf32>
    %17 = vector.broadcast %1 : vector<1x32xf32> to vector<8x32xf32>
    %18 = arith.mulf %16, %17 : vector<8x32xf32>
    %cst_7 = arith.constant dense<0.000000e+00> : vector<8xf32>
    %19 = vector.multi_reduction <add>, %18, %cst_7 [1] : vector<8x32xf32> to vector<8xf32>
    %20 = vector.shape_cast %19 : vector<8xf32> to vector<8x1xf32>
    %21 = vector.extract_strided_slice %6 {offsets = [2, 0], sizes = [8, 32], strides = [1, 1]} : vector<10x32xf32> to vector<8x32xf32>
    %22 = arith.addf %21, %5 : vector<8x32xf32>
    %23 = math.tanh %22 : vector<8x32xf32>
    %24 = vector.broadcast %1 : vector<1x32xf32> to vector<8x32xf32>
    %25 = arith.mulf %23, %24 : vector<8x32xf32>
    %cst_8 = arith.constant dense<0.000000e+00> : vector<8xf32>
    %26 = vector.multi_reduction <add>, %25, %cst_8 [1] : vector<8x32xf32> to vector<8xf32>
    %27 = vector.shape_cast %26 : vector<8xf32> to vector<8x1xf32>
    %28 = arith.maximumf %13, %20 : vector<8x1xf32>
    %29 = arith.maximumf %28, %27 : vector<8x1xf32>
    %30 = arith.subf %13, %29 : vector<8x1xf32>
    %31 = math.exp %30 : vector<8x1xf32>
    %32 = arith.subf %20, %29 : vector<8x1xf32>
    %33 = math.exp %32 : vector<8x1xf32>
    %34 = arith.subf %27, %29 : vector<8x1xf32>
    %35 = math.exp %34 : vector<8x1xf32>
    %36 = arith.addf %31, %33 : vector<8x1xf32>
    %37 = arith.addf %36, %35 : vector<8x1xf32>
    %38 = tpu.reciprocal %37 {approx = true} : vector<8x1xf32> -> vector<8x1xf32>
    %cst_9 = arith.constant 0.000000e+00 : f32
    %39 = vector.broadcast %cst_9 : f32 to vector<8x32xf32>
    %c0_10 = arith.constant 0 : index
    %c0_11 = arith.constant 0 : index
    %c0_12 = arith.constant 0 : index
    %40 = vector.load %arg1[%c0_10, %c0_11, %c0_12] : memref<2x10x32xf32, #tpu.memory_space<vmem>>, vector<1x8x32xf32>
    %41 = vector.shape_cast %40 : vector<1x8x32xf32> to vector<8x32xf32>
    %42 = arith.mulf %31, %38 : vector<8x1xf32>
    %43 = vector.broadcast %42 : vector<8x1xf32> to vector<8x32xf32>
    %44 = arith.mulf %43, %41 : vector<8x32xf32>
    %45 = arith.addf %39, %44 : vector<8x32xf32>
    %c0_13 = arith.constant 0 : index
    %c1 = arith.constant 1 : index
    %c0_14 = arith.constant 0 : index
    %46 = vector.load %arg1[%c0_13, %c1, %c0_14] : memref<2x10x32xf32, #tpu.memory_space<vmem>>, vector<1x8x32xf32>
    %47 = vector.shape_cast %46 : vector<1x8x32xf32> to vector<8x32xf32>
    %48 = arith.mulf %33, %38 : vector<8x1xf32>
    %49 = vector.broadcast %48 : vector<8x1xf32> to vector<8x32xf32>
    %50 = arith.mulf %49, %47 : vector<8x32xf32>
    %51 = arith.addf %45, %50 : vector<8x32xf32>
    %c0_15 = arith.constant 0 : index
    %c2 = arith.constant 2 : index
    %c0_16 = arith.constant 0 : index
    %52 = vector.load %arg1[%c0_15, %c2, %c0_16] : memref<2x10x32xf32, #tpu.memory_space<vmem>>, vector<1x8x32xf32>
    %53 = vector.shape_cast %52 : vector<1x8x32xf32> to vector<8x32xf32>
    %54 = arith.mulf %35, %38 : vector<8x1xf32>
    %55 = vector.broadcast %54 : vector<8x1xf32> to vector<8x32xf32>
    %56 = arith.mulf %55, %53 : vector<8x32xf32>
    %57 = arith.addf %51, %56 : vector<8x32xf32>
    %c0_17 = arith.constant 0 : index
    %c0_18 = arith.constant 0 : index
    %c0_19 = arith.constant 0 : index
    %58 = vector.load %arg4[%c0_17, %c0_18, %c0_19] : memref<2x8x32xf32, #tpu.memory_space<vmem>>, vector<1x8x32xf32>
    %59 = vector.shape_cast %58 : vector<1x8x32xf32> to vector<8x32xf32>
    %60 = vector.shape_cast %57 : vector<8x32xf32> to vector<1x8x32xf32>
    tpu.vector_store %arg4[%c0_17, %c0_18, %c0_19], %60 {strides = array<i32>} : memref<2x8x32xf32, #tpu.memory_space<vmem>>, vector<1x8x32xf32>,
    %c1_20 = arith.constant 1 : index
    %c0_21 = arith.constant 0 : index
    %c0_22 = arith.constant 0 : index
    %61 = vector.load %arg1[%c1_20, %c0_21, %c0_22] : memref<2x10x32xf32, #tpu.memory_space<vmem>>, vector<1x10x32xf32>
    %62 = vector.shape_cast %61 : vector<1x10x32xf32> to vector<10x32xf32>
    %cst_23 = arith.constant dense<0.000000e+00> : vector<10x64xf32>
    %63 = tpu.matmul %62, %0, %cst_23 {dimension_numbers = #tpu.dot_dimension_numbers<[1], [0], [0], [1], [0, 0, 1, 1], [], []>} : vector<10x32xf32>, vector<32x64xf32>, vector<10x64xf32> -> vector<10x64xf32>
    %64 = vector.extract_strided_slice %63 {offsets = [1, 0], sizes = [8, 32], strides = [1, 1]} : vector<10x64xf32> to vector<8x32xf32>
    %65 = vector.extract_strided_slice %63 {offsets = [0, 32], sizes = [10, 32], strides = [1, 1]} : vector<10x64xf32> to vector<10x32xf32>
    %66 = vector.extract_strided_slice %65 {offsets = [0, 0], sizes = [8, 32], strides = [1, 1]} : vector<10x32xf32> to vector<8x32xf32>
    %67 = arith.addf %66, %64 : vector<8x32xf32>
    %68 = math.tanh %67 : vector<8x32xf32>
    %69 = vector.broadcast %1 : vector<1x32xf32> to vector<8x32xf32>
    %70 = arith.mulf %68, %69 : vector<8x32xf32>
    %cst_24 = arith.constant dense<0.000000e+00> : vector<8xf32>
    %71 = vector.multi_reduction <add>, %70, %cst_24 [1] : vector<8x32xf32> to vector<8xf32>
    %72 = vector.shape_cast %71 : vector<8xf32> to vector<8x1xf32>
    %73 = vector.extract_strided_slice %65 {offsets = [1, 0], sizes = [8, 32], strides = [1, 1]} : vector<10x32xf32> to vector<8x32xf32>
    %74 = arith.addf %73, %64 : vector<8x32xf32>
    %75 = math.tanh %74 : vector<8x32xf32>
    %76 = vector.broadcast %1 : vector<1x32xf32> to vector<8x32xf32>
    %77 = arith.mulf %75, %76 : vector<8x32xf32>
    %cst_25 = arith.constant dense<0.000000e+00> : vector<8xf32>
    %78 = vector.multi_reduction <add>, %77, %cst_25 [1] : vector<8x32xf32> to vector<8xf32>
    %79 = vector.shape_cast %78 : vector<8xf32> to vector<8x1xf32>
    %80 = vector.extract_strided_slice %65 {offsets = [2, 0], sizes = [8, 32], strides = [1, 1]} : vector<10x32xf32> to vector<8x32xf32>
    %81 = arith.addf %80, %64 : vector<8x32xf32>
    %82 = math.tanh %81 : vector<8x32xf32>
    %83 = vector.broadcast %1 : vector<1x32xf32> to vector<8x32xf32>
    %84 = arith.mulf %82, %83 : vector<8x32xf32>
    %cst_26 = arith.constant dense<0.000000e+00> : vector<8xf32>
    %85 = vector.multi_reduction <add>, %84, %cst_26 [1] : vector<8x32xf32> to vector<8xf32>
    %86 = vector.shape_cast %85 : vector<8xf32> to vector<8x1xf32>
    %87 = arith.maximumf %72, %79 : vector<8x1xf32>
    %88 = arith.maximumf %87, %86 : vector<8x1xf32>
    %89 = arith.subf %72, %88 : vector<8x1xf32>
    %90 = math.exp %89 : vector<8x1xf32>
    %91 = arith.subf %79, %88 : vector<8x1xf32>
    %92 = math.exp %91 : vector<8x1xf32>
    %93 = arith.subf %86, %88 : vector<8x1xf32>
    %94 = math.exp %93 : vector<8x1xf32>
    %95 = arith.addf %90, %92 : vector<8x1xf32>
    %96 = arith.addf %95, %94 : vector<8x1xf32>
    %97 = tpu.reciprocal %96 {approx = true} : vector<8x1xf32> -> vector<8x1xf32>
    %cst_27 = arith.constant 0.000000e+00 : f32
    %98 = vector.broadcast %cst_27 : f32 to vector<8x32xf32>
    %c1_28 = arith.constant 1 : index
    %c0_29 = arith.constant 0 : index
    %c0_30 = arith.constant 0 : index
    %99 = vector.load %arg1[%c1_28, %c0_29, %c0_30] : memref<2x10x32xf32, #tpu.memory_space<vmem>>, vector<1x8x32xf32>
    %100 = vector.shape_cast %99 : vector<1x8x32xf32> to vector<8x32xf32>
    %101 = arith.mulf %90, %97 : vector<8x1xf32>
    %102 = vector.broadcast %101 : vector<8x1xf32> to vector<8x32xf32>
    %103 = arith.mulf %102, %100 : vector<8x32xf32>
    %104 = arith.addf %98, %103 : vector<8x32xf32>
    %c1_31 = arith.constant 1 : index
    %c1_32 = arith.constant 1 : index
    %c0_33 = arith.constant 0 : index
    %105 = vector.load %arg1[%c1_31, %c1_32, %c0_33] : memref<2x10x32xf32, #tpu.memory_space<vmem>>, vector<1x8x32xf32>
    %106 = vector.shape_cast %105 : vector<1x8x32xf32> to vector<8x32xf32>
    %107 = arith.mulf %92, %97 : vector<8x1xf32>
    %108 = vector.broadcast %107 : vector<8x1xf32> to vector<8x32xf32>
    %109 = arith.mulf %108, %106 : vector<8x32xf32>
    %110 = arith.addf %104, %109 : vector<8x32xf32>
    %c1_34 = arith.constant 1 : index
    %c2_35 = arith.constant 2 : index
    %c0_36 = arith.constant 0 : index
    %111 = vector.load %arg1[%c1_34, %c2_35, %c0_36] : memref<2x10x32xf32, #tpu.memory_space<vmem>>, vector<1x8x32xf32>
    %112 = vector.shape_cast %111 : vector<1x8x32xf32> to vector<8x32xf32>
    %113 = arith.mulf %94, %97 : vector<8x1xf32>
    %114 = vector.broadcast %113 : vector<8x1xf32> to vector<8x32xf32>
    %115 = arith.mulf %114, %112 : vector<8x32xf32>
    %116 = arith.addf %110, %115 : vector<8x32xf32>
    %c1_37 = arith.constant 1 : index
    %c0_38 = arith.constant 0 : index
    %c0_39 = arith.constant 0 : index
    %117 = vector.load %arg4[%c1_37, %c0_38, %c0_39] : memref<2x8x32xf32, #tpu.memory_space<vmem>>, vector<1x8x32xf32>
    %118 = vector.shape_cast %117 : vector<1x8x32xf32> to vector<8x32xf32>
    %119 = vector.shape_cast %116 : vector<8x32xf32> to vector<1x8x32xf32>
    tpu.vector_store %arg4[%c1_37, %c0_38, %c0_39], %119 {strides = array<i32>} : memref<2x8x32xf32, #tpu.memory_space<vmem>>, vector<1x8x32xf32>,
    return
  }
  func.func @transform_0(%arg0: i32) -> (i32, i32, i32) {
    %c0_i32 = arith.constant 0 : i32
    %c0_i32_0 = arith.constant 0 : i32
    %c0_i32_1 = arith.constant 0 : i32
    return %arg0, %c0_i32, %c0_i32_0 : i32, i32, i32
  }
  func.func @transform_1(%arg0: i32) -> (i32, i32) {
    %c0_i32 = arith.constant 0 : i32
    %c0_i32_0 = arith.constant 0 : i32
    %c0_i32_1 = arith.constant 0 : i32
    return %c0_i32, %c0_i32_0 : i32, i32
  }
  func.func @transform_2(%arg0: i32) -> (i32, i32) {
    %c0_i32 = arith.constant 0 : i32
    %c0_i32_0 = arith.constant 0 : i32
    %c0_i32_1 = arith.constant 0 : i32
    return %c0_i32, %c0_i32_0 : i32, i32
  }
  func.func @transform_3(%arg0: i32) -> (i32, i32, i32) {
    %c0_i32 = arith.constant 0 : i32
    %c0_i32_0 = arith.constant 0 : i32
    %c0_i32_1 = arith.constant 0 : i32
    return %arg0, %c0_i32, %c0_i32_0 : i32, i32, i32
  }
}

</mosaic_0001>

<bundles_post_ra>
// kernel: tpu_custom_call.1
= control target key start
LH: loop header
LB: loop body
LE: loop exit
PB: predicated region body
PF: predicated region fallthrough
CT: control target
= control target key end

     0   :  { %s720_s0 = inlined_call_operand.vmem [shape: f32[2,10,32], index: 0, kind: input, shape index: {}]   ;;  %s721_s1 = inlined_call_operand.vmem [shape: f32[32,64], index: 1, kind: input, shape index: {}]   ;;  %s722_s2 = inlined_call_operand.vmem [shape: f32[1,32], index: 2, kind: input, shape index: {}]   ;;  %s723_s3 = inlined_call_operand.hbm [shape: f32[2,8,32], index: 3, kind: output, shape index: {}]  }
   0x1   :  { %v18_v0 = vld [vmem:[%s721_s1 + $0x18] sm:$0xff]  ;;  %v17_v1 = vld [vmem:[%s721_s1 + $0x10] sm:$0xff]  ;;  %v16_v2 = vld [vmem:[%s721_s1 + $0x8] sm:$0xff] }
   0x2   :  { %41 = vmatpush.msra.mxu0 %v18_v0  ;;  %498 = vmatpush.msra.mxu2 %v18_v0 }
   0x3   :  { %502 = vmatpush.msra.mxu3 %v18_v0  ;;  %272 = vmatpush.msra.mxu1 %v18_v0 }
   0x4   :  { %42 = vmatpush.msra.mxu0 %v17_v1  ;;  %499 = vmatpush.msra.mxu2 %v17_v1 }
   0x5   :  { %8 = vsyncpa [#allocation3], 0  ;;  %503 = vmatpush.msra.mxu3 %v17_v1  ;;  %v15_v3 = vld [vmem:[%s721_s1] sm:$0xff]  ;;  %273 = vmatpush.msra.mxu1 %v17_v1  ;;  %vm22_vm0 = vcmask 261120   ;;  %v21_v5 = vld [vmem:[%s720_s0 + $0x8] sm:$0x3] }
   0x6   :  { %43 = vmatpush.msra.mxu0 %v16_v2  ;;  %500 = vmatpush.msra.mxu2 %v16_v2  ;;  %v627_v4 = vld [vmem:[%s720_s0] sm:$0xff]  ;;  %v492_v6 = vld [vmem:[%s720_s0 + $0x18] sm:$0x3]  ;;  %v643_v8 = vld [vmem:[%s720_s0 + $0x10] sm:$0xff]  ;;  %s586_s29 = smov 32   ;;  %vm54_vm1 = vcmask 1046528  }
   0x7   :  { %504 = vmatpush.msra.mxu3 %v16_v2  ;;  %274 = vmatpush.msra.mxu1 %v16_v2  ;;  %v515_v7 = vld [vmem:[%s722_s2] ss:$0 sm:$0xff]  ;;  %vm104_vm2 = vcmask 1040384   ;;  %s587_s2 = smov 96   ;;  %vm96_vm3 = vcmask 261121   ;;  %vm128_vm4 = vcmask 261122  }
   0x8   :  { %44 = vmatpush.msra.mxu0 %v15_v3  ;;  %501 = vmatpush.msra.mxu2 %v15_v3  ;;  %vm100_vm5 = vcmask 253952   ;;  %vm132_vm6 = vcmask 254976   ;;  %vm145_vm7 = vcmask 1045504   ;;  %s477_s14 = sshll.u32 %s723_s3, 4  ;;  %s590_s15 = smov 128   ;;  %s478_s14 = int_to_ptr.hbm [resolvable:$true] %s477_s14 }
   0x9   :  { %505 = vmatpush.msra.mxu3 %v15_v3  ;;  %489 = vmatmul.msk.f32.vlgmr.msra.gmra.mxu0 %vm22_vm0, %v627_v4  ;;  %s591_s16 = smov 8  }
   0xa   :  { %490 = vmatmul.msk.f32.vlgmr.msra.gmra.mxu2 %vm22_vm0, %v21_v5  ;;  %494 = vmatmul.msk.f32.vlgmr.msra.gmra.mxu3 %vm22_vm0, %v492_v6 }
   0xb   :  { %275 = vmatpush.msra.mxu1 %v15_v3  ;;  %65 = vrot.lane.b32.xlu0 %v515_v7, %s586_s29 }
   0xc   :  { %493 = vmatmul.msk.f32.vlgmr.msra.gmra.mxu1 %vm22_vm0, %v643_v8 }
  0x7d   :  { %v66_v27 = vpop.permute.xlu0 %65 }
  0x86   :  { %v46_v9 = vpop.f32.mrf.mxu0 }
  0x87   :  { %76 = vrot.lane.b32.xlu2 %v46_v9, %s586_s29  ;;  %v55_v14 = vrot.slane %v46_v9, 1  ;;  %v105_v16 = vrot.slane %v46_v9, 7 }
  0x89   :  { %v653_v12 = vpop.f32.mrf.mxu1 }
  0x8a   :  { %v327_v19 = vrot.slane %v653_v12, 7  ;;  %v285_v23 = vrot.slane %v653_v12, 1 }
  0x8d   :  { %v649_v10 = vpop.f32.mrf.mxu3  ;;  %v651_v11 = vpop.f32.mrf.mxu2 }
  0x8e   :  { %303 = vrot.lane.b32.xlu0 %v649_v10, %s586_s29  ;;  %v56_v13 = vrot.slane %v651_v11, 1  ;;  %v106_v17 = vrot.slane %v651_v11, 7  ;;  %v328_v20 = vrot.slane %v649_v10, 7  ;;  %v286_v22 = vrot.slane %v649_v10, 1 }
  0x8f   :  { %301 = vrot.lane.b32.xlu2 %v653_v12, %s586_s29 }
  0x90   :  { %v57_v15 = vsel %vm54_vm1, %v55_v14, %v56_v13  ;;  %v107_v18 = vsel %vm104_vm2, %v105_v16, %v106_v17  ;;  %v329_v21 = vsel %vm104_vm2, %v327_v19, %v328_v20  ;;  %v287_v24 = vsel %vm54_vm1, %v285_v23, %v286_v22 }
  0x96   :  { %58 = vrot.lane.b32.xlu0 %v57_v15, %s586_s29 }
  0x97   :  { %108 = vrot.lane.b32.xlu2 %v105_v16, %s586_s29 }
  0x9e   :  { %110 = vrot.lane.b32.xlu0 %v107_v18, %s586_s29 }
  0x9f   :  { %330 = vrot.lane.b32.xlu2 %v327_v19, %s586_s29 }
  0xa6   :  { %332 = vrot.lane.b32.xlu0 %v329_v21, %s586_s29 }
  0xa7   :  { %78 = vrot.lane.b32.xlu2 %v651_v11, %s586_s29 }
  0xaf   :  { %288 = vrot.lane.b32.xlu2 %v287_v24, %s586_s29 }
  0xe1   :  { %v77_v25 = vpop.permute.xlu2 %76 }
  0xe2   :  { %v82_v26 = vadd.f32 %v77_v25, %v46_v9 }
  0xe4   :  { %516 = vtanh.f32 %v82_v26 }
  0xe9   :  { %v302_v28 = vpop.permute.xlu2 %301 }
  0xea   :  { %v517_v29 = vpop.eup %516  ;;  %v307_v30 = vadd.f32 %v302_v28, %v653_v12 }
  0xeb   :  { %v86_v31 = vmul.f32 %v517_v29, %v66_v27 }
  0xec   :  { %518 = vtanh.f32 %v307_v30 }
  0xed   :  { %90 = vrot.lane.b32.xlu0 %v86_v31, %s587_s2 }
  0xf1   :  { %v109_v32 = vpop.permute.xlu2 %108 }
  0xf2   :  { %v519_v33 = vpop.eup %518  ;;  %v114_v34 = vadd.f32 %v109_v32, %v46_v9 }
  0xf3   :  { %v311_v35 = vmul.f32 %v519_v33, %v66_v27 }
  0xf4   :  { %520 = vtanh.f32 %v114_v34 }
  0xf5   :  { %315 = vrot.lane.b32.xlu1 %v311_v35, %s587_s2 }
  0xf9   :  { %v331_v36 = vpop.permute.xlu2 %330 }
  0xfa   :  { %v521_v37 = vpop.eup %520  ;;  %v336_v38 = vadd.f32 %v331_v36, %v653_v12 }
  0xfb   :  { %v118_v39 = vmul.f32 %v521_v37, %v66_v27 }
  0xfc   :  { %522 = vtanh.f32 %v336_v38 }
  0xfd   :  { %122 = vrot.lane.b32.xlu0 %v118_v39, %s587_s2 }
 0x100   :  { %v304_v40 = vpop.permute.xlu0 %303 }
 0x101   :  { %v79_v41 = vpop.permute.xlu2 %78  ;;  %v308_v45 = vadd.f32 %v304_v40, %v649_v10 }
 0x102   :  { %v523_v42 = vpop.eup %522  ;;  %v83_v43 = vadd.f32 %v79_v41, %v651_v11  ;;  %v588_v41 = vmov 0  }
 0x103   :  { %v340_v44 = vmul.f32 %v523_v42, %v66_v27  ;;  %512 = vset.pattern.permute.xlu0 %v588_v41  ;;  %514 = vset.pattern.permute.xlu2 %v588_v41 }
 0x104   :  { %524 = vtanh.f32 %v83_v43  ;;  %513 = vset.pattern.permute.xlu1 %v588_v41 }
 0x105   :  { %344 = vrot.lane.b32.xlu0 %v340_v44, %s587_s2  ;;  %526 = vtanh.f32 %v308_v45 }
 0x108   :  { %v59_v46 = vpop.permute.xlu0 %58 }
 0x109   :  { %v61_v47 = vadd.f32 %v59_v46, %v46_v9  ;;  %v289_v55 = vpop.permute.xlu2 %288 }
 0x10a   :  { %v525_v48 = vpop.eup %524  ;;  %v291_v57 = vadd.f32 %v289_v55, %v653_v12 }
 0x10b   :  { %528 = vtanh.f32 %v61_v47  ;;  %v87_v49 = vmul.f32 %v525_v48, %v66_v27  ;;  %v527_v50 = vpop.eup %526 }
 0x10c   :  { %v312_v56 = vmul.f32 %v527_v50, %v66_v27 }
 0x10d   :  { %92 = vrot.lane.b32.xlu0 %v87_v49, %s587_s2 }
 0x110   :  { %v111_v51 = vpop.permute.xlu0 %110 }
 0x111   :  { %v529_v52 = vpop.eup %528  ;;  %v115_v53 = vadd.f32 %v111_v51, %v651_v11 }
 0x112   :  { %v68_v54 = vmul.f32 %v529_v52, %v66_v27 }
 0x113   :  { %530 = vtanh.f32 %v115_v53 }
 0x114   :  { %70 = vrot.lane.b32.xlu1 %v68_v54, %s587_s2  ;;  %532 = vtanh.f32 %v291_v57 }
 0x115   :  { %317 = vrot.lane.b32.xlu0 %v312_v56, %s587_s2 }
 0x118   :  { %v333_v58 = vpop.permute.xlu0 %332 }
 0x119   :  { %v531_v59 = vpop.eup %530  ;;  %v337_v60 = vadd.f32 %v333_v58, %v649_v10 }
 0x11a   :  { %v119_v61 = vmul.f32 %v531_v59, %v66_v27  ;;  %v533_v62 = vpop.eup %532 }
 0x11b   :  { %534 = vtanh.f32 %v337_v60  ;;  %v293_v1 = vmul.f32 %v533_v62, %v66_v27 }
 0x11d   :  { %124 = vrot.lane.b32.xlu0 %v119_v61, %s587_s2 }
 0x121   :  { %v535_v63 = vpop.eup %534 }
 0x122   :  { %v341_v0 = vmul.f32 %v535_v63, %v66_v27 }
 0x124   :  { %346 = vrot.lane.b32.xlu1 %v341_v0, %s587_s2 }
 0x125   :  { %295 = vrot.lane.b32.xlu0 %v293_v1, %s587_s2 }
 0x15f   :  { %v91_v2 = vpop.permute.xlu0 %90 }
 0x160   :  { %v97_v3 = vsel %vm96_vm3, %v91_v2, 0.0 }
 0x161   :  { %98 = vadd.xlane.f32.xlu2 %v97_v3 }
 0x167   :  { %v316_v7 = vpop.permute.xlu1 %315 }
 0x168   :  { %v321_v10 = vsel %vm96_vm3, %v316_v7, 0.0 }
 0x16f   :  { %v123_v5 = vpop.permute.xlu0 %122 }
 0x170   :  { %v129_v6 = vsel %vm128_vm4, %v123_v5, 0.0 }
 0x171   :  { %130 = vadd.xlane.f32.xlu2 %v129_v6 }
 0x177   :  { %v345_v9 = vpop.permute.xlu0 %344 }
 0x178   :  { %v350_v11 = vsel %vm128_vm4, %v345_v9, 0.0 }
 0x179   :  { %322 = vadd.xlane.f32.xlu2 %v321_v10  ;;  %351 = vadd.xlane.f32.xlu0 %v350_v11 }
 0x17f   :  { %v93_v12 = vpop.permute.xlu0 %92 }
 0x180   :  { %v101_v13 = vsel %vm100_vm5, %v93_v12, 0.0 }
 0x181   :  { %102 = vadd.xlane.f32.xlu1 %v101_v13 }
 0x186   :  { %v71_v14 = vpop.permute.xlu1 %70 }
 0x187   :  { %v318_v15 = vpop.permute.xlu0 %317  ;;  %v73_v16 = vsel %vm22_vm0, %v71_v14, 0.0 }
 0x188   :  { %v324_v17 = vsel %vm100_vm5, %v318_v15, 0.0 }
 0x189   :  { %74 = vadd.xlane.f32.xlu1 %v73_v16  ;;  %325 = vadd.xlane.f32.xlu2 %v324_v17 }
 0x18f   :  { %v125_v18 = vpop.permute.xlu0 %124 }
 0x190   :  { %v133_v19 = vsel %vm132_vm6, %v125_v18, 0.0 }
 0x191   :  { %134 = vadd.xlane.f32.xlu1 %v133_v19 }
 0x196   :  { %v347_v20 = vpop.permute.xlu1 %346 }
 0x197   :  { %v353_v21 = vsel %vm132_vm6, %v347_v20, 0.0  ;;  %v296_v22 = vpop.permute.xlu0 %295 }
 0x198   :  { %354 = vadd.xlane.f32.xlu2 %v353_v21  ;;  %v298_v23 = vsel %vm22_vm0, %v296_v22, 0.0 }
 0x1a0   :  { %299 = vadd.xlane.f32.xlu2 %v298_v23 }
 0x1d4   :  { %v99_v24 = vpop.xlane.xlu2 %98 }
 0x1d5   :  { %v138_v30 = vrot.slane %v99_v24, 1 }
 0x1e4   :  { %v131_v25 = vpop.xlane.xlu2 %130 }
 0x1e5   :  { %v146_v33 = vrot.slane %v131_v25, 2 }
 0x1ec   :  { %v323_v27 = vpop.xlane.xlu2 %322  ;;  %v352_v53 = vpop.xlane.xlu0 %351 }
 0x1ed   :  { %v358_v54 = vrot.slane %v323_v27, 1  ;;  %v365_v57 = vrot.slane %v352_v53, 2 }
 0x1f4   :  { %v103_v26 = vpop.xlane.xlu1 %102 }
 0x1f5   :  { %v139_v29 = vrot.slane %v103_v26, 1 }
 0x1f7   :  { %v140_v34 = vsel %vm54_vm1, %v138_v30, %v139_v29 }
 0x1fc   :  { %v75_v28 = vpop.xlane.xlu1 %74  ;;  %v326_v31 = vpop.xlane.xlu2 %325 }
 0x1fd   :  { %v142_v36 = vmax.f32 %v75_v28, %v140_v34  ;;  %v359_v51 = vrot.slane %v326_v31, 1 }
 0x1ff   :  { %v360_v58 = vsel %vm54_vm1, %v358_v54, %v359_v51 }
 0x204   :  { %v135_v32 = vpop.xlane.xlu1 %134 }
 0x205   :  { %v147_v35 = vrot.slane %v135_v32, 2 }
 0x207   :  { %v148_v37 = vsel %vm145_vm7, %v146_v33, %v147_v35 }
 0x208   :  { %v150_v38 = vmax.f32 %v142_v36, %v148_v37 }
 0x20a   :  { %v155_v39 = vrot.slane %v150_v38, 7  ;;  %v163_v40 = vrot.slane %v150_v38, 6  ;;  %v151_v47 = vsub.f32 %v75_v28, %v150_v38 }
 0x20b   :  { %v355_v42 = vpop.xlane.xlu2 %354 }
 0x20c   :  { %v157_v43 = vsub.f32 %v99_v24, %v155_v39  ;;  %v158_v44 = vsub.f32 %v103_v26, %v155_v39  ;;  %v165_v45 = vsub.f32 %v131_v25, %v163_v40  ;;  %v166_v46 = vsub.f32 %v135_v32, %v163_v40 }
 0x20d   :  { %v366_v55 = vrot.slane %v355_v42, 2  ;;  %v152_v56 = vmul.f32 1.442695, %v151_v47 }
 0x20e   :  { %v159_v48 = vmul.f32 1.442695, %v157_v43  ;;  %v161_v49 = vmul.f32 1.442695, %v158_v44  ;;  %v167_v50 = vmul.f32 1.442695, %v165_v45 }
 0x20f   :  { %v169_v52 = vmul.f32 1.442695, %v166_v46  ;;  %v367_v61 = vsel %vm145_vm7, %v365_v57, %v366_v55 }
 0x210   :  { %536 = vpow2.f32 %v159_v48 }
 0x211   :  { %538 = vpow2.f32 %v161_v49 }
 0x212   :  { %540 = vpow2.f32 %v167_v50 }
 0x213   :  { %542 = vpow2.f32 %v169_v52  ;;  %v300_v59 = vpop.xlane.xlu2 %299 }
 0x214   :  { %v362_v60 = vmax.f32 %v300_v59, %v360_v58  ;;  %544 = vpow2.f32 %v152_v56  ;;  %v195_v58 = vld [vmem:[%s720_s0 + $0x1] sm:$0xff] }
 0x216   :  { %v537_v62 = vpop.eup %536  ;;  %v369_v63 = vmax.f32 %v362_v60, %v367_v61  ;;  %v223_v60 = vld [vmem:[%s720_s0 + $0x2] sm:$0xff] }
 0x217   :  { %v689_v0 = vpop.eup %538  ;;  %v173_v1 = vrot.slane %v537_v62, 1 }
 0x218   :  { %v541_v2 = vpop.eup %540  ;;  %v174_v3 = vrot.slane %v689_v0, 1  ;;  %v370_v5 = vsub.f32 %v300_v59, %v369_v63  ;;  %v374_v6 = vrot.slane %v369_v63, 7  ;;  %v382_v7 = vrot.slane %v369_v63, 6 }
 0x219   :  { %v543_v9 = vpop.eup %542  ;;  %v180_v10 = vrot.slane %v541_v2, 2 }
 0x21a   :  { %v181_v11 = vrot.slane %v543_v9, 2  ;;  %v371_v12 = vmul.f32 1.442695, %v370_v5  ;;  %v376_v13 = vsub.f32 %v323_v27, %v374_v6  ;;  %v377_v14 = vsub.f32 %v326_v31, %v374_v6  ;;  %v545_v18 = vpop.eup %544 }
 0x21b   :  { %v384_v15 = vsub.f32 %v352_v53, %v382_v7  ;;  %v385_v16 = vsub.f32 %v355_v42, %v382_v7  ;;  %v175_v17 = vsel %vm54_vm1, %v173_v1, %v174_v3  ;;  %v496_v3 = vld [vmem:[%s720_s0 + $0x11] sm:$0xff] }
 0x21c   :  { %v378_v19 = vmul.f32 1.442695, %v376_v13  ;;  %v380_v20 = vmul.f32 1.442695, %v377_v14  ;;  %546 = vpow2.f32 %v371_v12  ;;  %v177_v23 = vadd.f32 %v545_v18, %v175_v17 }
 0x21d   :  { %v386_v21 = vmul.f32 1.442695, %v384_v15  ;;  %v388_v22 = vmul.f32 1.442695, %v385_v16  ;;  %v182_v24 = vsel %vm145_vm7, %v180_v10, %v181_v11  ;;  %v431_v11 = vrot.slane %v496_v3, 7 }
 0x21e   :  { %548 = vpow2.f32 %v378_v19  ;;  %v184_v25 = vadd.f32 %v182_v24, %v177_v23 }
 0x21f   :  { %550 = vpow2.f32 %v380_v20 }
 0x220   :  { %552 = vpow2.f32 %v386_v21 }
 0x221   :  { %554 = vpow2.f32 %v388_v22 }
 0x222   :  { %556 = vrcp.f32 %v184_v25  ;;  %v547_v26 = vpop.eup %546 }
 0x224   :  { %v549_v27 = vpop.eup %548 }
 0x225   :  { %v551_v28 = vpop.eup %550  ;;  %v392_v29 = vrot.slane %v549_v27, 1 }
 0x226   :  { %v553_v30 = vpop.eup %552  ;;  %v393_v31 = vrot.slane %v551_v28, 1 }
 0x227   :  { %v555_v32 = vpop.eup %554  ;;  %v399_v33 = vrot.slane %v553_v30, 2 }
 0x228   :  { %v557_v34 = vpop.eup %556  ;;  %v394_v35 = vsel %vm54_vm1, %v392_v29, %v393_v31  ;;  %v400_v36 = vrot.slane %v555_v32, 2 }
 0x229   :  { %v396_v37 = vadd.f32 %v547_v26, %v394_v35  ;;  %v187_v38 = vmul.f32 %v557_v34, %v545_v18  ;;  %v197_v39 = vrot.slane %v557_v34, 7  ;;  %v224_v43 = vrot.slane %v557_v34, 6 }
 0x22a   :  { %v401_v40 = vsel %vm145_vm7, %v399_v33, %v400_v36 }
 0x22b   :  { %v403_v41 = vadd.f32 %v401_v40, %v396_v37  ;;  %190 = vperm.xlu0 %512, %v187_v38   ;;  %v199_v42 = vmul.f32 %v537_v62, %v197_v39  ;;  %v227_v44 = vmul.f32 %v543_v9, %v224_v43  ;;  %v226_v46 = vmul.f32 %v541_v2, %v224_v43  ;;  %v497_v9 = vld [vmem:[%s720_s0 + $0x12] sm:$0xff]  ;;  %s589_s0 = smov [#allocation2]  }
 0x22c   :  { %v200_v52 = vmul.f32 %v689_v0, %v197_v39  ;;  %v212_v62 = vrot.slane %v195_v58, 7  ;;  %v239_v0 = vrot.slane %v223_v60, 6  ;;  %v458_v17 = vrot.slane %v497_v9, 6  ;;  %s475_s11 = sshll.u32 %s589_s0, 4  ;;  %s476_s11 = int_to_ptr.vmem [resolvable:$true] %s475_s11 }
 0x22d   :  { %558 = vrcp.f32 %v403_v41  ;;  %203 = vperm.xlu2 %514, %v199_v42  }
 0x233   :  { %v559_v45 = vpop.eup %558  ;;  %235 = vperm.xlu0 %512, %v227_v44  }
 0x234   :  { %v406_v47 = vmul.f32 %v559_v45, %v547_v26  ;;  %v443_v48 = vrot.slane %v559_v45, 6  ;;  %v416_v50 = vrot.slane %v559_v45, 7 }
 0x235   :  { %230 = vperm.xlu2 %514, %v226_v46  }
 0x236   :  { %409 = vperm.xlu1 %513, %v406_v47   ;;  %v446_v49 = vmul.f32 %v555_v32, %v443_v48  ;;  %v418_v51 = vmul.f32 %v549_v27, %v416_v50  ;;  %v445_v53 = vmul.f32 %v553_v30, %v443_v48  ;;  %v419_v54 = vmul.f32 %v551_v28, %v416_v50 }
 0x23b   :  { %454 = vperm.xlu0 %512, %v446_v49  }
 0x23d   :  { %422 = vperm.xlu2 %514, %v418_v51  }
 0x23e   :  { %208 = vperm.xlu1 %513, %v200_v52  }
 0x245   :  { %449 = vperm.xlu2 %514, %v445_v53  }
 0x246   :  { %427 = vperm.xlu1 %513, %v419_v54  }
 0x287   :  { %v204_v55 = vpop.permute.xlu2 %203 }
 0x288   :  { %v214_v1 = vmul.f32 %v212_v62, %v204_v55 }
 0x28a   :  { %v218_v10 = vrot.slane %v214_v1, 1 }
 0x28f   :  { %v231_v57 = vpop.permute.xlu2 %230 }
 0x290   :  { %v241_v6 = vmul.f32 %v239_v0, %v231_v57 }
 0x292   :  { %v245_v16 = vrot.slane %v241_v6, 2 }
 0x297   :  { %v423_v63 = vpop.permute.xlu2 %422 }
 0x298   :  { %v433_v21 = vmul.f32 %v431_v11, %v423_v63 }
 0x29a   :  { %v437_v28 = vrot.slane %v433_v21, 1 }
 0x29d   :  { %v191_v56 = vpop.permute.xlu0 %190 }
 0x29e   :  { %v193_v14 = vmul.f32 %v191_v56, %v627_v4 }
 0x29f   :  { %v450_v19 = vpop.permute.xlu2 %449 }
 0x2a0   :  { %v460_v26 = vmul.f32 %v458_v17, %v450_v19 }
 0x2a2   :  { %v464_v31 = vrot.slane %v460_v26, 2 }
 0x2a5   :  { %v236_v61 = vpop.permute.xlu0 %235 }
 0x2a6   :  { %v242_v2 = vmul.f32 %v239_v0, %v236_v61 }
 0x2a8   :  { %v410_v59 = vpop.permute.xlu1 %409  ;;  %v246_v12 = vrot.slane %v242_v2, 2 }
 0x2a9   :  { %v412_v30 = vmul.f32 %v643_v8, %v410_v59 }
 0x2aa   :  { %v247_v22 = vsel %vm145_vm7, %v245_v16, %v246_v12 }
 0x2ad   :  { %v455_v15 = vpop.permute.xlu0 %454 }
 0x2ae   :  { %v461_v23 = vmul.f32 %v458_v17, %v455_v15 }
 0x2b0   :  { %v209_v5 = vpop.permute.xlu1 %208  ;;  %v465_v29 = vrot.slane %v461_v23, 2 }
 0x2b1   :  { %v215_v7 = vmul.f32 %v212_v62, %v209_v5 }
 0x2b2   :  { %v466_v34 = vsel %vm145_vm7, %v464_v31, %v465_v29 }
 0x2b3   :  { %v219_v13 = vrot.slane %v215_v7, 1 }
 0x2b5   :  { %v220_v18 = vsel %vm54_vm1, %v218_v10, %v219_v13 }
 0x2b6   :  { %v222_v20 = vadd.f32 %v220_v18, %v193_v14 }
 0x2b8   :  { %v249_v24 = vadd.f32 %v247_v22, %v222_v20  ;;  %v428_v25 = vpop.permute.xlu1 %427 }
 0x2b9   :  { %v434_v27 = vmul.f32 %v431_v11, %v428_v25 }
 0x2ba   :  { %250 = vst.msk [vmem:[#allocation2] sm:$0xff] %vm22_vm0, %v249_v24 }
 0x2bb   :  { %v438_v4 = vrot.slane %v434_v27, 1 }
 0x2bd   :  { %v439_v32 = vsel %vm54_vm1, %v437_v28, %v438_v4 }
 0x2be   :  { %v441_v33 = vadd.f32 %v439_v32, %v412_v30 }
 0x2c0   :  { %v468_v35 = vadd.f32 %v466_v34, %v441_v33 }
 0x2c2   :  { %470 = vst.msk [vmem:[#allocation2 + $0x8] sm:$0xff] %vm22_vm0, %v468_v35 }
 0x2c3   :  { %483 = dma.vmem_to_hbm [thread:$0]  %s476_s11, 256, %s478_s14, [#allocation3], %s590_s15, %s590_s15, %s591_s16  }
 0x2c4   :  { %584 = dma.done.wait [#allocation3], 256  }
 0x2c5   :  { %585 = vsyncadd [#allocation3], 4294967040 }
 0x2c6   :  { %488 = vsyncpa [#allocation3], 1 }

</bundles_post_ra>
